<compile_context>
chip_gen: v7x
topology: tpu7x:2x2x1
jax: 0.10.0
libtpu: 0.0.40
codegen_flags: <defaults>
</compile_context>

<pallas_src>
import math

import jax
import jax.numpy as jnp
from jax.experimental import pallas as pl
from jax.experimental.pallas import tpu as pltpu

_LANE = 128       # vreg lane width (fast axis)
_SUBLANE = 8      # f32 sublane granularity
# Cap per-block bytes so double-buffered input + output (~4x block) stays a
# small fraction of the tightest scoped-VMEM default (16 MiB on v5e).
_MAX_BLOCK_BYTES = 1 << 20  # 1 MiB per block


def _identity_copy_kernel(x_ref, o_ref):
    # Base-class Features defines no transformation: pure passthrough.
    o_ref[...] = x_ref[...]


def _pick_row_tile(rows, itemsize):
    """Largest row tile that is a multiple of the sublane count, divides
    `rows`, and keeps one block under _MAX_BLOCK_BYTES.  Returns None if no
    legal tile exists (caller falls back to a whole-view block)."""
    if rows % _SUBLANE != 0:
        return None
    max_rows = max(_SUBLANE, _MAX_BLOCK_BYTES // (_LANE * itemsize))
    max_rows = (max_rows // _SUBLANE) * _SUBLANE
    if rows <= max_rows:
        return rows
    tile = max_rows
    while tile >= _SUBLANE:
        if rows % tile == 0:
            return tile
        tile -= _SUBLANE
    return None


def _whole_view_copy(x2):
    """Single-block copy of a (small) array kept entirely in VMEM."""
    return pl.pallas_call(
        _identity_copy_kernel,
        out_shape=jax.ShapeDtypeStruct(x2.shape, x2.dtype),
        in_specs=[pl.BlockSpec(memory_space=pltpu.VMEM)],
        out_specs=pl.BlockSpec(memory_space=pltpu.VMEM),
    )(x2)


def _lane_dense_copy(x):
    """Streamed identity copy over a lane-dense (rows, 128) view of x."""
    shape = x.shape
    total = math.prod(shape)
    rows = total // _LANE
    x2 = x.reshape(rows, _LANE)

    tile = _pick_row_tile(rows, x.dtype.itemsize)
    if tile is None or tile == rows:
        # Small (or oddly-sized) tensor: one block covering the full view.
        return _whole_view_copy(x2).reshape(shape)

    # Large tensor: 1-D grid over row tiles -> double-buffered, pipelined DMA.
    grid = (rows // tile,)
    y2 = pl.pallas_call(
        _identity_copy_kernel,
        out_shape=jax.ShapeDtypeStruct((rows, _LANE), x.dtype),
        grid=grid,
        in_specs=[pl.BlockSpec((tile, _LANE), lambda i: (i, 0))],
        out_specs=pl.BlockSpec((tile, _LANE), lambda i: (i, 0)),
        compiler_params=pltpu.CompilerParams(
            # Independent tiles: lets v7x shard the grid across both
            # TensorCores; free (no-op) on single-TC v5e/v6e.
            dimension_semantics=("parallel",),
            # Explicit, conservative VMEM budget (<= default on all gens;
            # actual residency is ~4x one block = ~4 MiB).
            vmem_limit_bytes=16 * 1024 * 1024,
        ),
    )(x2)
    return y2.reshape(shape)


class Features:
    """JAX/Pallas mirror of the abstract PyTorch Features base module."""

    def __init__(self):
        # Matches the PyTorch __init__: no parameters, sentinel feature size.
        self.feature_size = -1

    def forward(self, x):
        # NOTE: absolute-fastest identity would be `return x` (no kernel, no
        # HBM traffic); the streamed copy below keeps a Pallas kernel boundary
        # while staying near the HBM roofline.
        total = math.prod(x.shape) if x.ndim > 0 else 1
        if total > 0 and total % _LANE == 0:
            return _lane_dense_copy(x)
        # Fallback for shapes that cannot be viewed lane-densely.
        return _whole_view_copy(x)

    def __call__(self, x):
        return self.forward(x)


if __name__ == "__main__":
    key = jax.random.PRNGKey(0)
    model = Features()

    # Small NCHW input consistent with a feature-extractor front end.
    x = jax.random.normal(key, (2, 4, 16, 16), dtype=jnp.float32)
    y = jax.block_until_ready(model(x))
    assert y.shape == x.shape and y.dtype == x.dtype
    assert bool(jnp.array_equal(y, x))

    # Modestly larger activation to exercise the tiled / gridded copy path
    # (rows = 4096 > 2048-row tile cap -> grid of 2 parallel blocks).
    x_big = jax.random.normal(key, (2, 16, 128, 128), dtype=jnp.float32)
    y_big = jax.block_until_ready(model(x_big))
    assert y_big.shape == x_big.shape and y_big.dtype == x_big.dtype
    assert bool(jnp.array_equal(y_big, x_big))

    assert model.feature_size == -1
    print("KERNEL_OK")
</pallas_src>

<mosaic_0001>
module attributes {stable_mosaic.version = 11 : i64} {
  func.func @_identity_copy_kernel(%arg0: memref<16x128xf32, #tpu.memory_space<vmem>>, %arg1: memref<16x128xf32, #tpu.memory_space<vmem>>) attributes {dimension_semantics = [], scalar_prefetch = 0 : i64, scratch_operands = 0 : i64, tpu.core_type = #tpu.core_type<tc>} {
    %c0 = arith.constant 0 : index
    %c0_0 = arith.constant 0 : index
    %0 = vector.load %arg0[%c0, %c0_0] : memref<16x128xf32, #tpu.memory_space<vmem>>, vector<16x128xf32>
    %c0_1 = arith.constant 0 : index
    %c0_2 = arith.constant 0 : index
    %1 = vector.load %arg1[%c0_1, %c0_2] : memref<16x128xf32, #tpu.memory_space<vmem>>, vector<16x128xf32>
    tpu.vector_store %arg1[%c0_1, %c0_2], %0 {strides = array<i32>} : memref<16x128xf32, #tpu.memory_space<vmem>>, vector<16x128xf32>,
    return
  }
}

</mosaic_0001>

<bundles_post_ra>
// kernel: tpu_custom_call.1
= control target key start
LH: loop header
LB: loop body
LE: loop exit
PB: predicated region body
PF: predicated region fallthrough
CT: control target
= control target key end

     0   :  { %6 = vsyncpa [#allocation3], 0  ;;  %s134_s0 = inlined_call_operand.hbm [shape: f32[16,128], index: 0, kind: input, shape index: {}]   ;;  %s135_s1 = inlined_call_operand.hbm [shape: f32[16,128], index: 1, kind: output, shape index: {}]  }
   0x1   :  { %7 = vsyncpa [#allocation4], 0  ;;  %s96_s6 = smov [#allocation2]   ;;  %s48_s10 = scalar_lea.hbm %s134_s0, 256 }
   0x2   :  { %s13_s7 = sshll.u32 %s96_s6, 4  ;;  %p49_p0 = scmp.ne.s32.totalorder %s134_s0, %s48_s10  ;;  %s14_s7 = int_to_ptr.vmem [resolvable:$true] %s13_s7 }
   0x3   :  { %p52_p1 = scmp.lt.u32.totalorder %s48_s10, %s134_s0 }
   0x5   :  { %p54_p2 = pnand %p52_p1, %p49_p0 }
   0x7   :  { %57 = shalt.err (!%p54_p2)
}
   0x8   :  { %s58_s15 = scalar_lea.vmem %s14_s7, 256  ;;  %p63_p4 = scmp.lt.s32.totalorder %s14_s7, %s14_s7 }
   0x9   :  { %p59_p3 = scmp.ne.s32.totalorder %s14_s7, %s58_s15  ;;  %p64_p5 = scmp.lt.s32.totalorder %s58_s15, %s58_s15 }
   0xb   :  { %p65_p6 = por %p64_p5, %p63_p4 }
   0xd   :  { %p66_p7 = pnand %p65_p6, %p59_p3 }
   0xf   :  { %69 = shalt.err (!%p66_p7)
}
  0x10   :  { %s97_s16 = smov 128   ;;  %s98_s17 = smov 8  }
  0x11   :  { %19 = dma.hbm_to_vmem [thread:$0]  %s134_s0, 256, %s14_s7, [#allocation3], %s97_s16, %s97_s16, %s98_s17  }
  0x12   :  { %92 = dma.done.wait [#allocation3], 256  }
  0x13   :  { %93 = vsyncadd [#allocation3], 4294967040  ;;  %s99_s20 = smov [#allocation5]   ;;  %v23_v0 = vld [vmem:[#allocation2] sm:$0xff]  ;;  %v24_v1 = vld [vmem:[#allocation2 + $0x8] sm:$0xff] }
  0x14   :  { %s32_s21 = sshll.u32 %s99_s20, 4  ;;  %25 = vst [vmem:[#allocation5] sm:$0xff] %v23_v0  ;;  %26 = vst [vmem:[#allocation5 + $0x8] sm:$0xff] %v24_v1  ;;  %s33_s21 = int_to_ptr.vmem [resolvable:$true] %s32_s21 }
  0x15   :  { %s70_s22 = scalar_lea.vmem %s33_s21, 256  ;;  %p75_p9 = scmp.lt.s32.totalorder %s33_s21, %s33_s21 }
  0x16   :  { %p71_p8 = scmp.ne.s32.totalorder %s33_s21, %s70_s22  ;;  %p76_p10 = scmp.lt.s32.totalorder %s70_s22, %s70_s22 }
  0x18   :  { %p77_p11 = por %p76_p10, %p75_p9 }
  0x1a   :  { %p78_p12 = pnand %p77_p11, %p71_p8 }
  0x1c   :  { %81 = shalt.err (!%p78_p12)
}
  0x1d   :  { %s82_s0 = scalar_lea.hbm %s135_s1, 256 }
  0x1e   :  { %p83_p13 = scmp.ne.s32.totalorder %s135_s1, %s82_s0  ;;  %p86_p0 = scmp.lt.u32.totalorder %s82_s0, %s135_s1 }
  0x20   :  { %p88_p1 = pnand %p86_p0, %p83_p13 }
  0x22   :  { %91 = shalt.err (!%p88_p1)
}
  0x23   :  { %38 = dma.vmem_to_hbm [thread:$0]  %s33_s21, 256, %s135_s1, [#allocation4], %s97_s16, %s97_s16, %s98_s17  }
  0x24   :  { %94 = dma.done.wait [#allocation4], 256  }
  0x25   :  { %95 = vsyncadd [#allocation4], 4294967040 }
  0x26   :  { %42 = vsyncpa [#allocation3], 1 }
  0x27   :  { %43 = vsyncpa [#allocation4], 1 }

</bundles_post_ra>
